<compile_context>
chip_gen: v5e
topology: v5e:2x2
jax: 0.10.0
libtpu: 0.0.40
codegen_flags: <defaults>
</compile_context>

<pallas_src>
import functools

import jax
import jax.numpy as jnp
from jax import lax
from jax.experimental import pallas as pl
from jax.experimental.pallas import tpu as pltpu
import numpy as np

EPS = 1e-5
STATS_LANES = 8          # lane width of the tiny per-tile statistics output
AUX_ROWS = 16            # rows 0..8: per-tap pool bias, row 9: column mask, rest zero


def _phase1_kernel(patches_ref, w_ref, aux_ref, ypre_ref, stats_ref, *, cin, c_conv):
    """Per M-tile: conv + maxpool (pre-BN activations) and masked BN partial stats."""
    # ---- main branch: 3x3 / stride-2 conv as a single MXU matmul -> [c_conv, TM] f32
    conv = jnp.dot(w_ref[...], patches_ref[...], preferred_element_type=jnp.float32)

    # ---- extension branch: 3x3 / stride-2 maxpool from the SAME patch slab.
    # aux rows 0..8 hold an additive per-tap bias: 0 for in-image taps, -inf for
    # padding taps, so PyTorch's -inf-padded maxpool semantics are preserved.
    p = patches_ref[...].astype(jnp.float32)          # [cin*9, TM]
    b = aux_ref[...]                                  # [AUX_ROWS, TM]
    pooled = []
    for c in range(cin):
        base = c * 9
        acc = p[base:base + 1, :] + b[0:1, :]
        for t in range(1, 9):
            acc = jnp.maximum(acc, p[base + t:base + t + 1, :] + b[t:t + 1, :])
        pooled.append(acc)                            # [1, TM] each
    pool = jnp.concatenate(pooled, axis=0)            # [cin, TM]

    # ---- channel "concat" = disjoint sublane-range stores in the [C, M] layout
    c_tot = c_conv + cin
    ypre_ref[0:c_conv, :] = conv
    ypre_ref[c_conv:c_tot, :] = pool

    # ---- single-pass BN statistics for this tile (mask drops padded M columns)
    mask = b[9:10, :]                                 # [1, TM], 1.0 = real column
    cm = conv * mask
    pm = pool * mask
    stats_ref[0:c_conv, :] = jnp.broadcast_to(
        jnp.sum(cm, axis=1, keepdims=True), (c_conv, STATS_LANES))
    stats_ref[c_conv:c_tot, :] = jnp.broadcast_to(
        jnp.sum(pm, axis=1, keepdims=True), (cin, STATS_LANES))
    stats_ref[c_tot:c_tot + c_conv, :] = jnp.broadcast_to(
        jnp.sum(conv * cm, axis=1, keepdims=True), (c_conv, STATS_LANES))
    stats_ref[c_tot + c_conv:2 * c_tot, :] = jnp.broadcast_to(
        jnp.sum(pool * pm, axis=1, keepdims=True), (cin, STATS_LANES))


def _phase2_kernel(ypre_ref, params_ref, out_ref):
    """Apply folded BatchNorm affine (scale, shift) + PReLU on a [16, TM] tile."""
    y = ypre_ref[...]                                 # [16, TM] f32
    scale = params_ref[:, 0:1]                        # [16, 1]
    shift = params_ref[:, 1:2]
    alpha = params_ref[:, 2:3]                        # shared slope, replicated per row
    z = y * scale + shift
    out_ref[...] = jnp.where(z >= 0, z, alpha * z)


def initial_block_pallas(x_nchw, conv_w, gamma, beta, alpha, *, tile_m=2048):
    """x_nchw: [N, Cin, H, W] f32.  conv_w: [13, Cin, 3, 3].  Returns [N, 16, Ho, Wo]."""
    N, Cin, H, W = x_nchw.shape
    c_conv = conv_w.shape[0]                          # 13
    c_tot = c_conv + Cin                              # 16
    Ho = (H - 1) // 2 + 1
    Wo = (W - 1) // 2 + 1
    M = N * Ho * Wo

    # ---- choose lane (M) tiling: TM a multiple of 128, pad M up to MT * TM ----
    def _round_up(a, b):
        return (a + b - 1) // b * b

    TM = min(tile_m, _round_up(M, 128))
    TM = max(128, _round_up(TM, 128))
    M_pad = _round_up(M, TM)
    MT = M_pad // TM

    # ---- im2col: one zero-padded, lane-dense [Cin*9, M] bf16 slab shared by conv & pool
    # TODO(synk): build the 9 shifted taps inside the kernel from the raw input
    # (stride-2 lane gather) to avoid materializing the 9x-expanded slab in HBM.
    xz = jnp.pad(x_nchw, ((0, 0), (0, 0), (1, 1), (1, 1)))
    taps = []
    for kh in range(3):
        for kw in range(3):
            taps.append(xz[:, :, kh:kh + 2 * Ho:2, kw:kw + 2 * Wo:2])   # [N,Cin,Ho,Wo]
    patches = jnp.stack(taps, axis=2)                                   # [N,Cin,9,Ho,Wo]
    patches = patches.transpose(1, 2, 0, 3, 4).reshape(Cin * 9, M)      # row = c*9 + t
    patches = jnp.pad(patches, ((0, 0), (0, M_pad - M))).astype(jnp.bfloat16)

    w2d = conv_w.reshape(c_conv, Cin * 9).astype(jnp.bfloat16)          # [13, 27]

    # ---- aux slab: rows 0..8 = per-tap maxpool bias (0 / -inf), row 9 = column mask
    oh = jnp.arange(Ho)
    ow = jnp.arange(Wo)
    bias_rows = []
    for kh in range(3):
        rv = (2 * oh + kh - 1 >= 0) & (2 * oh + kh - 1 < H)             # [Ho]
        for kw in range(3):
            cv = (2 * ow + kw - 1 >= 0) & (2 * ow + kw - 1 < W)         # [Wo]
            bias_rows.append(jnp.where(rv[:, None] & cv[None, :], 0.0, -jnp.inf))
    bias = jnp.stack(bias_rows, axis=0)                                 # [9, Ho, Wo]
    bias = jnp.broadcast_to(bias[:, None], (9, N, Ho, Wo)).reshape(9, M)
    bias = jnp.pad(bias, ((0, 0), (0, M_pad - M)))        # padded cols -> bias 0 (finite pool)
    mask = jnp.pad(jnp.ones((1, M), jnp.float32), ((0, 0), (0, M_pad - M)))
    aux = jnp.concatenate(
        [bias.astype(jnp.float32), mask,
         jnp.zeros((AUX_ROWS - 10, M_pad), jnp.float32)], axis=0)       # [16, M_pad]

    # ---- phase 1: conv + pool + per-tile masked stats -------------------------------
    kernel1 = functools.partial(_phase1_kernel, cin=Cin, c_conv=c_conv)
    ypre, stats_part = pl.pallas_call(
        kernel1,
        out_shape=(
            jax.ShapeDtypeStruct((c_tot, M_pad), jnp.float32),
            jax.ShapeDtypeStruct((MT * 2 * c_tot, STATS_LANES), jnp.float32),
        ),
        grid=(MT,),
        in_specs=[
            pl.BlockSpec((Cin * 9, TM), lambda i: (0, i)),
            pl.BlockSpec((c_conv, Cin * 9), lambda i: (0, 0)),
            pl.BlockSpec((AUX_ROWS, TM), lambda i: (0, i)),
        ],
        out_specs=(
            pl.BlockSpec((c_tot, TM), lambda i: (0, i)),
            pl.BlockSpec((2 * c_tot, STATS_LANES), lambda i: (i, 0)),
        ),
        compiler_params=pltpu.CompilerParams(dimension_semantics=("parallel",)),
    )(patches, w2d, aux)

    # ---- finalize BatchNorm statistics (tiny) and fold into one scale/shift pair ----
    stats = stats_part[:, 0].reshape(MT, 2 * c_tot)
    sums = jnp.sum(stats[:, :c_tot], axis=0)
    sumsq = jnp.sum(stats[:, c_tot:], axis=0)
    mean = sums / M
    var = jnp.maximum(sumsq / M - mean * mean, 0.0)       # biased variance (training BN)
    scale = gamma.astype(jnp.float32) * lax.rsqrt(var + EPS)
    shift = beta.astype(jnp.float32) - mean * scale
    alpha_s = jnp.asarray(alpha, jnp.float32).reshape(-1)[0]
    params = jnp.zeros((c_tot, STATS_LANES), jnp.float32)
    params = params.at[:, 0].set(scale).at[:, 1].set(shift).at[:, 2].set(alpha_s)

    # ---- phase 2: normalize + PReLU, lane-dense [16, TM] stores ----------------------
    out_flat = pl.pallas_call(
        _phase2_kernel,
        out_shape=jax.ShapeDtypeStruct((c_tot, M_pad), jnp.float32),
        grid=(MT,),
        in_specs=[
            pl.BlockSpec((c_tot, TM), lambda i: (0, i)),
            pl.BlockSpec((c_tot, STATS_LANES), lambda i: (0, 0)),
        ],
        out_specs=pl.BlockSpec((c_tot, TM), lambda i: (0, i)),
        compiler_params=pltpu.CompilerParams(dimension_semantics=("parallel",)),
    )(ypre, params)

    # [16, M_pad] -> drop padding -> NCHW
    return out_flat[:, :M].reshape(c_tot, N, Ho, Wo).transpose(1, 0, 2, 3)


def initial_block_reference(x_nchw, conv_w, gamma, beta, alpha):
    """Pure-JAX f32 reference with identical semantics (for correctness check)."""
    conv = lax.conv_general_dilated(
        x_nchw, conv_w, window_strides=(2, 2), padding=((1, 1), (1, 1)),
        dimension_numbers=("NCHW", "OIHW", "NCHW"))
    pool = lax.reduce_window(
        x_nchw, -jnp.inf, lax.max,
        window_dimensions=(1, 1, 3, 3), window_strides=(1, 1, 2, 2),
        padding=((0, 0), (0, 0), (1, 1), (1, 1)))
    out = jnp.concatenate([conv, pool], axis=1)
    mean = jnp.mean(out, axis=(0, 2, 3), keepdims=True)
    var = jnp.mean((out - mean) ** 2, axis=(0, 2, 3), keepdims=True)
    out = (out - mean) * lax.rsqrt(var + EPS)
    out = out * gamma.reshape(1, -1, 1, 1) + beta.reshape(1, -1, 1, 1)
    return jnp.where(out >= 0, out, alpha.reshape(()) * out)


if __name__ == "__main__":
    key = jax.random.PRNGKey(0)
    k_x1, k_x2, k_w, k_g, k_b = jax.random.split(key, 5)

    Cin, c_conv = 3, 13                       # in_channels fixed at 3 by the module
    conv_w = 0.2 * jax.random.normal(k_w, (c_conv, Cin, 3, 3), dtype=jnp.float32)
    gamma = 1.0 + 0.1 * jax.random.normal(k_g, (16,), dtype=jnp.float32)
    beta = 0.1 * jax.random.normal(k_b, (16,), dtype=jnp.float32)
    alpha = jnp.array([0.25], dtype=jnp.float32)   # nn.PReLU() default init

    # bf16 patches/weights on the MXU -> compare against the f32 reference with a
    # tolerance that covers bf16 rounding of the inputs.
    TOL = dict(rtol=3e-2, atol=3e-2)

    # Case 1: single-tile path (N=2, 16x16).
    x1 = jax.random.normal(k_x1, (2, Cin, 16, 16), dtype=jnp.float32)
    out1 = jax.block_until_ready(initial_block_pallas(x1, conv_w, gamma, beta, alpha))
    ref1 = jax.block_until_ready(initial_block_reference(x1, conv_w, gamma, beta, alpha))
    np.testing.assert_allclose(np.asarray(out1), np.asarray(ref1), **TOL)

    # Case 2: multi-tile + padded-column path (odd output spatial size, small tile).
    x2 = jax.random.normal(k_x2, (2, Cin, 18, 18), dtype=jnp.float32)
    out2 = jax.block_until_ready(
        initial_block_pallas(x2, conv_w, gamma, beta, alpha, tile_m=128))
    ref2 = jax.block_until_ready(initial_block_reference(x2, conv_w, gamma, beta, alpha))
    np.testing.assert_allclose(np.asarray(out2), np.asarray(ref2), **TOL)

    print("KERNEL_OK")
</pallas_src>

<mosaic_0001>
module attributes {stable_mosaic.version = 11 : i64} {
  func.func @_phase1_kernel(%arg0: i32, %arg1: memref<27x128xbf16, #tpu.memory_space<vmem>>, %arg2: memref<13x27xbf16, #tpu.memory_space<vmem>>, %arg3: memref<16x128xf32, #tpu.memory_space<vmem>>, %arg4: memref<16x128xf32, #tpu.memory_space<vmem>>, %arg5: memref<32x8xf32, #tpu.memory_space<vmem>>) attributes {dimension_semantics = [#tpu.dimension_semantics<parallel>], iteration_bounds = array<i64: 1>, scalar_prefetch = 0 : i64, scratch_operands = 0 : i64, tpu.core_type = #tpu.core_type<tc>, window_params = [{transform_indices = @transform_0, window_bounds = array<i64: 27, 128>}, {pipeline_mode = #tpu.pipeline_mode<synchronous>, transform_indices = @transform_1, window_bounds = array<i64: 13, 27>}, {transform_indices = @transform_2, window_bounds = array<i64: 16, 128>}, {transform_indices = @transform_3, window_bounds = array<i64: 16, 128>}, {transform_indices = @transform_4, window_bounds = array<i64: 32, 8>}]} {
    %c0 = arith.constant 0 : index
    %c0_0 = arith.constant 0 : index
    %0 = vector.load %arg2[%c0, %c0_0] : memref<13x27xbf16, #tpu.memory_space<vmem>>, vector<13x27xbf16>
    %c0_1 = arith.constant 0 : index
    %c0_2 = arith.constant 0 : index
    %1 = vector.load %arg1[%c0_1, %c0_2] : memref<27x128xbf16, #tpu.memory_space<vmem>>, vector<27x128xbf16>
    %cst = arith.constant dense<0.000000e+00> : vector<13x128xf32>
    %2 = tpu.matmul %0, %1, %cst {dimension_numbers = #tpu.dot_dimension_numbers<[1], [0], [0], [1], [0, 0, 1, 1], [], []>} : vector<13x27xbf16>, vector<27x128xbf16>, vector<13x128xf32> -> vector<13x128xf32>
    %c0_3 = arith.constant 0 : index
    %c0_4 = arith.constant 0 : index
    %3 = vector.load %arg1[%c0_3, %c0_4] : memref<27x128xbf16, #tpu.memory_space<vmem>>, vector<27x128xbf16>
    %4 = arith.extf %3 : vector<27x128xbf16> to vector<27x128xf32>
    %c0_5 = arith.constant 0 : index
    %c0_6 = arith.constant 0 : index
    %5 = vector.load %arg3[%c0_5, %c0_6] : memref<16x128xf32, #tpu.memory_space<vmem>>, vector<16x128xf32>
    %6 = vector.extract_strided_slice %4 {offsets = [0, 0], sizes = [1, 128], strides = [1, 1]} : vector<27x128xf32> to vector<1x128xf32>
    %7 = vector.extract_strided_slice %5 {offsets = [0, 0], sizes = [1, 128], strides = [1, 1]} : vector<16x128xf32> to vector<1x128xf32>
    %8 = arith.addf %6, %7 : vector<1x128xf32>
    %9 = vector.extract_strided_slice %4 {offsets = [1, 0], sizes = [1, 128], strides = [1, 1]} : vector<27x128xf32> to vector<1x128xf32>
    %10 = vector.extract_strided_slice %5 {offsets = [1, 0], sizes = [1, 128], strides = [1, 1]} : vector<16x128xf32> to vector<1x128xf32>
    %11 = arith.addf %9, %10 : vector<1x128xf32>
    %12 = arith.maximumf %8, %11 : vector<1x128xf32>
    %13 = vector.extract_strided_slice %4 {offsets = [2, 0], sizes = [1, 128], strides = [1, 1]} : vector<27x128xf32> to vector<1x128xf32>
    %14 = vector.extract_strided_slice %5 {offsets = [2, 0], sizes = [1, 128], strides = [1, 1]} : vector<16x128xf32> to vector<1x128xf32>
    %15 = arith.addf %13, %14 : vector<1x128xf32>
    %16 = arith.maximumf %12, %15 : vector<1x128xf32>
    %17 = vector.extract_strided_slice %4 {offsets = [3, 0], sizes = [1, 128], strides = [1, 1]} : vector<27x128xf32> to vector<1x128xf32>
    %18 = vector.extract_strided_slice %5 {offsets = [3, 0], sizes = [1, 128], strides = [1, 1]} : vector<16x128xf32> to vector<1x128xf32>
    %19 = arith.addf %17, %18 : vector<1x128xf32>
    %20 = arith.maximumf %16, %19 : vector<1x128xf32>
    %21 = vector.extract_strided_slice %4 {offsets = [4, 0], sizes = [1, 128], strides = [1, 1]} : vector<27x128xf32> to vector<1x128xf32>
    %22 = vector.extract_strided_slice %5 {offsets = [4, 0], sizes = [1, 128], strides = [1, 1]} : vector<16x128xf32> to vector<1x128xf32>
    %23 = arith.addf %21, %22 : vector<1x128xf32>
    %24 = arith.maximumf %20, %23 : vector<1x128xf32>
    %25 = vector.extract_strided_slice %4 {offsets = [5, 0], sizes = [1, 128], strides = [1, 1]} : vector<27x128xf32> to vector<1x128xf32>
    %26 = vector.extract_strided_slice %5 {offsets = [5, 0], sizes = [1, 128], strides = [1, 1]} : vector<16x128xf32> to vector<1x128xf32>
    %27 = arith.addf %25, %26 : vector<1x128xf32>
    %28 = arith.maximumf %24, %27 : vector<1x128xf32>
    %29 = vector.extract_strided_slice %4 {offsets = [6, 0], sizes = [1, 128], strides = [1, 1]} : vector<27x128xf32> to vector<1x128xf32>
    %30 = vector.extract_strided_slice %5 {offsets = [6, 0], sizes = [1, 128], strides = [1, 1]} : vector<16x128xf32> to vector<1x128xf32>
    %31 = arith.addf %29, %30 : vector<1x128xf32>
    %32 = arith.maximumf %28, %31 : vector<1x128xf32>
    %33 = vector.extract_strided_slice %4 {offsets = [7, 0], sizes = [1, 128], strides = [1, 1]} : vector<27x128xf32> to vector<1x128xf32>
    %34 = vector.extract_strided_slice %5 {offsets = [7, 0], sizes = [1, 128], strides = [1, 1]} : vector<16x128xf32> to vector<1x128xf32>
    %35 = arith.addf %33, %34 : vector<1x128xf32>
    %36 = arith.maximumf %32, %35 : vector<1x128xf32>
    %37 = vector.extract_strided_slice %4 {offsets = [8, 0], sizes = [1, 128], strides = [1, 1]} : vector<27x128xf32> to vector<1x128xf32>
    %38 = vector.extract_strided_slice %5 {offsets = [8, 0], sizes = [1, 128], strides = [1, 1]} : vector<16x128xf32> to vector<1x128xf32>
    %39 = arith.addf %37, %38 : vector<1x128xf32>
    %40 = arith.maximumf %36, %39 : vector<1x128xf32>
    %41 = vector.extract_strided_slice %4 {offsets = [9, 0], sizes = [1, 128], strides = [1, 1]} : vector<27x128xf32> to vector<1x128xf32>
    %42 = vector.extract_strided_slice %5 {offsets = [0, 0], sizes = [1, 128], strides = [1, 1]} : vector<16x128xf32> to vector<1x128xf32>
    %43 = arith.addf %41, %42 : vector<1x128xf32>
    %44 = vector.extract_strided_slice %4 {offsets = [10, 0], sizes = [1, 128], strides = [1, 1]} : vector<27x128xf32> to vector<1x128xf32>
    %45 = vector.extract_strided_slice %5 {offsets = [1, 0], sizes = [1, 128], strides = [1, 1]} : vector<16x128xf32> to vector<1x128xf32>
    %46 = arith.addf %44, %45 : vector<1x128xf32>
    %47 = arith.maximumf %43, %46 : vector<1x128xf32>
    %48 = vector.extract_strided_slice %4 {offsets = [11, 0], sizes = [1, 128], strides = [1, 1]} : vector<27x128xf32> to vector<1x128xf32>
    %49 = vector.extract_strided_slice %5 {offsets = [2, 0], sizes = [1, 128], strides = [1, 1]} : vector<16x128xf32> to vector<1x128xf32>
    %50 = arith.addf %48, %49 : vector<1x128xf32>
    %51 = arith.maximumf %47, %50 : vector<1x128xf32>
    %52 = vector.extract_strided_slice %4 {offsets = [12, 0], sizes = [1, 128], strides = [1, 1]} : vector<27x128xf32> to vector<1x128xf32>
    %53 = vector.extract_strided_slice %5 {offsets = [3, 0], sizes = [1, 128], strides = [1, 1]} : vector<16x128xf32> to vector<1x128xf32>
    %54 = arith.addf %52, %53 : vector<1x128xf32>
    %55 = arith.maximumf %51, %54 : vector<1x128xf32>
    %56 = vector.extract_strided_slice %4 {offsets = [13, 0], sizes = [1, 128], strides = [1, 1]} : vector<27x128xf32> to vector<1x128xf32>
    %57 = vector.extract_strided_slice %5 {offsets = [4, 0], sizes = [1, 128], strides = [1, 1]} : vector<16x128xf32> to vector<1x128xf32>
    %58 = arith.addf %56, %57 : vector<1x128xf32>
    %59 = arith.maximumf %55, %58 : vector<1x128xf32>
    %60 = vector.extract_strided_slice %4 {offsets = [14, 0], sizes = [1, 128], strides = [1, 1]} : vector<27x128xf32> to vector<1x128xf32>
    %61 = vector.extract_strided_slice %5 {offsets = [5, 0], sizes = [1, 128], strides = [1, 1]} : vector<16x128xf32> to vector<1x128xf32>
    %62 = arith.addf %60, %61 : vector<1x128xf32>
    %63 = arith.maximumf %59, %62 : vector<1x128xf32>
    %64 = vector.extract_strided_slice %4 {offsets = [15, 0], sizes = [1, 128], strides = [1, 1]} : vector<27x128xf32> to vector<1x128xf32>
    %65 = vector.extract_strided_slice %5 {offsets = [6, 0], sizes = [1, 128], strides = [1, 1]} : vector<16x128xf32> to vector<1x128xf32>
    %66 = arith.addf %64, %65 : vector<1x128xf32>
    %67 = arith.maximumf %63, %66 : vector<1x128xf32>
    %68 = vector.extract_strided_slice %4 {offsets = [16, 0], sizes = [1, 128], strides = [1, 1]} : vector<27x128xf32> to vector<1x128xf32>
    %69 = vector.extract_strided_slice %5 {offsets = [7, 0], sizes = [1, 128], strides = [1, 1]} : vector<16x128xf32> to vector<1x128xf32>
    %70 = arith.addf %68, %69 : vector<1x128xf32>
    %71 = arith.maximumf %67, %70 : vector<1x128xf32>
    %72 = vector.extract_strided_slice %4 {offsets = [17, 0], sizes = [1, 128], strides = [1, 1]} : vector<27x128xf32> to vector<1x128xf32>
    %73 = vector.extract_strided_slice %5 {offsets = [8, 0], sizes = [1, 128], strides = [1, 1]} : vector<16x128xf32> to vector<1x128xf32>
    %74 = arith.addf %72, %73 : vector<1x128xf32>
    %75 = arith.maximumf %71, %74 : vector<1x128xf32>
    %76 = vector.extract_strided_slice %4 {offsets = [18, 0], sizes = [1, 128], strides = [1, 1]} : vector<27x128xf32> to vector<1x128xf32>
    %77 = vector.extract_strided_slice %5 {offsets = [0, 0], sizes = [1, 128], strides = [1, 1]} : vector<16x128xf32> to vector<1x128xf32>
    %78 = arith.addf %76, %77 : vector<1x128xf32>
    %79 = vector.extract_strided_slice %4 {offsets = [19, 0], sizes = [1, 128], strides = [1, 1]} : vector<27x128xf32> to vector<1x128xf32>
    %80 = vector.extract_strided_slice %5 {offsets = [1, 0], sizes = [1, 128], strides = [1, 1]} : vector<16x128xf32> to vector<1x128xf32>
    %81 = arith.addf %79, %80 : vector<1x128xf32>
    %82 = arith.maximumf %78, %81 : vector<1x128xf32>
    %83 = vector.extract_strided_slice %4 {offsets = [20, 0], sizes = [1, 128], strides = [1, 1]} : vector<27x128xf32> to vector<1x128xf32>
    %84 = vector.extract_strided_slice %5 {offsets = [2, 0], sizes = [1, 128], strides = [1, 1]} : vector<16x128xf32> to vector<1x128xf32>
    %85 = arith.addf %83, %84 : vector<1x128xf32>
    %86 = arith.maximumf %82, %85 : vector<1x128xf32>
    %87 = vector.extract_strided_slice %4 {offsets = [21, 0], sizes = [1, 128], strides = [1, 1]} : vector<27x128xf32> to vector<1x128xf32>
    %88 = vector.extract_strided_slice %5 {offsets = [3, 0], sizes = [1, 128], strides = [1, 1]} : vector<16x128xf32> to vector<1x128xf32>
    %89 = arith.addf %87, %88 : vector<1x128xf32>
    %90 = arith.maximumf %86, %89 : vector<1x128xf32>
    %91 = vector.extract_strided_slice %4 {offsets = [22, 0], sizes = [1, 128], strides = [1, 1]} : vector<27x128xf32> to vector<1x128xf32>
    %92 = vector.extract_strided_slice %5 {offsets = [4, 0], sizes = [1, 128], strides = [1, 1]} : vector<16x128xf32> to vector<1x128xf32>
    %93 = arith.addf %91, %92 : vector<1x128xf32>
    %94 = arith.maximumf %90, %93 : vector<1x128xf32>
    %95 = vector.extract_strided_slice %4 {offsets = [23, 0], sizes = [1, 128], strides = [1, 1]} : vector<27x128xf32> to vector<1x128xf32>
    %96 = vector.extract_strided_slice %5 {offsets = [5, 0], sizes = [1, 128], strides = [1, 1]} : vector<16x128xf32> to vector<1x128xf32>
    %97 = arith.addf %95, %96 : vector<1x128xf32>
    %98 = arith.maximumf %94, %97 : vector<1x128xf32>
    %99 = vector.extract_strided_slice %4 {offsets = [24, 0], sizes = [1, 128], strides = [1, 1]} : vector<27x128xf32> to vector<1x128xf32>
    %100 = vector.extract_strided_slice %5 {offsets = [6, 0], sizes = [1, 128], strides = [1, 1]} : vector<16x128xf32> to vector<1x128xf32>
    %101 = arith.addf %99, %100 : vector<1x128xf32>
    %102 = arith.maximumf %98, %101 : vector<1x128xf32>
    %103 = vector.extract_strided_slice %4 {offsets = [25, 0], sizes = [1, 128], strides = [1, 1]} : vector<27x128xf32> to vector<1x128xf32>
    %104 = vector.extract_strided_slice %5 {offsets = [7, 0], sizes = [1, 128], strides = [1, 1]} : vector<16x128xf32> to vector<1x128xf32>
    %105 = arith.addf %103, %104 : vector<1x128xf32>
    %106 = arith.maximumf %102, %105 : vector<1x128xf32>
    %107 = vector.extract_strided_slice %4 {offsets = [26, 0], sizes = [1, 128], strides = [1, 1]} : vector<27x128xf32> to vector<1x128xf32>
    %108 = vector.extract_strided_slice %5 {offsets = [8, 0], sizes = [1, 128], strides = [1, 1]} : vector<16x128xf32> to vector<1x128xf32>
    %109 = arith.addf %107, %108 : vector<1x128xf32>
    %110 = arith.maximumf %106, %109 : vector<1x128xf32>
    %111 = tpu.concatenate %40, %75, %110 in 0 : vector<1x128xf32>, vector<1x128xf32>, vector<1x128xf32> -> vector<3x128xf32>
    %c0_7 = arith.constant 0 : index
    %c0_8 = arith.constant 0 : index
    %112 = vector.load %arg4[%c0_7, %c0_8] : memref<16x128xf32, #tpu.memory_space<vmem>>, vector<13x128xf32>
    tpu.vector_store %arg4[%c0_7, %c0_8], %2 {strides = array<i32>} : memref<16x128xf32, #tpu.memory_space<vmem>>, vector<13x128xf32>,
    %c13 = arith.constant 13 : index
    %c0_9 = arith.constant 0 : index
    %113 = vector.load %arg4[%c13, %c0_9] : memref<16x128xf32, #tpu.memory_space<vmem>>, vector<3x128xf32>
    tpu.vector_store %arg4[%c13, %c0_9], %111 {strides = array<i32>} : memref<16x128xf32, #tpu.memory_space<vmem>>, vector<3x128xf32>,
    %114 = vector.extract_strided_slice %5 {offsets = [9, 0], sizes = [1, 128], strides = [1, 1]} : vector<16x128xf32> to vector<1x128xf32>
    %115 = vector.broadcast %114 : vector<1x128xf32> to vector<13x128xf32>
    %116 = arith.mulf %2, %115 : vector<13x128xf32>
    %117 = vector.broadcast %114 : vector<1x128xf32> to vector<3x128xf32>
    %118 = arith.mulf %111, %117 : vector<3x128xf32>
    %cst_10 = arith.constant dense<0.000000e+00> : vector<13xf32>
    %119 = vector.multi_reduction <add>, %116, %cst_10 [1] : vector<13x128xf32> to vector<13xf32>
    %120 = vector.shape_cast %119 : vector<13xf32> to vector<13x1xf32>
    %121 = vector.shape_cast %120 : vector<13x1xf32> to vector<13x1xf32>
    %122 = vector.broadcast %121 : vector<13x1xf32> to vector<13x8xf32>
    %c0_11 = arith.constant 0 : index
    %c0_12 = arith.constant 0 : index
    %123 = vector.load %arg5[%c0_11, %c0_12] : memref<32x8xf32, #tpu.memory_space<vmem>>, vector<13x8xf32>
    tpu.vector_store %arg5[%c0_11, %c0_12], %122 {strides = array<i32>} : memref<32x8xf32, #tpu.memory_space<vmem>>, vector<13x8xf32>,
    %cst_13 = arith.constant dense<0.000000e+00> : vector<3xf32>
    %124 = vector.multi_reduction <add>, %118, %cst_13 [1] : vector<3x128xf32> to vector<3xf32>
    %125 = vector.shape_cast %124 : vector<3xf32> to vector<3x1xf32>
    %126 = vector.shape_cast %125 : vector<3x1xf32> to vector<3x1xf32>
    %127 = vector.broadcast %126 : vector<3x1xf32> to vector<3x8xf32>
    %c13_14 = arith.constant 13 : index
    %c0_15 = arith.constant 0 : index
    %128 = vector.load %arg5[%c13_14, %c0_15] : memref<32x8xf32, #tpu.memory_space<vmem>>, vector<3x8xf32>
    tpu.vector_store %arg5[%c13_14, %c0_15], %127 {strides = array<i32>} : memref<32x8xf32, #tpu.memory_space<vmem>>, vector<3x8xf32>,
    %129 = arith.mulf %2, %116 : vector<13x128xf32>
    %cst_16 = arith.constant dense<0.000000e+00> : vector<13xf32>
    %130 = vector.multi_reduction <add>, %129, %cst_16 [1] : vector<13x128xf32> to vector<13xf32>
    %131 = vector.shape_cast %130 : vector<13xf32> to vector<13x1xf32>
    %132 = vector.shape_cast %131 : vector<13x1xf32> to vector<13x1xf32>
    %133 = vector.broadcast %132 : vector<13x1xf32> to vector<13x8xf32>
    %c16 = arith.constant 16 : index
    %c0_17 = arith.constant 0 : index
    %134 = vector.load %arg5[%c16, %c0_17] : memref<32x8xf32, #tpu.memory_space<vmem>>, vector<13x8xf32>
    tpu.vector_store %arg5[%c16, %c0_17], %133 {strides = array<i32>} : memref<32x8xf32, #tpu.memory_space<vmem>>, vector<13x8xf32>,
    %135 = arith.mulf %111, %118 : vector<3x128xf32>
    %cst_18 = arith.constant dense<0.000000e+00> : vector<3xf32>
    %136 = vector.multi_reduction <add>, %135, %cst_18 [1] : vector<3x128xf32> to vector<3xf32>
    %137 = vector.shape_cast %136 : vector<3xf32> to vector<3x1xf32>
    %138 = vector.shape_cast %137 : vector<3x1xf32> to vector<3x1xf32>
    %139 = vector.broadcast %138 : vector<3x1xf32> to vector<3x8xf32>
    %c29 = arith.constant 29 : index
    %c0_19 = arith.constant 0 : index
    %140 = vector.load %arg5[%c29, %c0_19] : memref<32x8xf32, #tpu.memory_space<vmem>>, vector<3x8xf32>
    tpu.vector_store %arg5[%c29, %c0_19], %139 {strides = array<i32>} : memref<32x8xf32, #tpu.memory_space<vmem>>, vector<3x8xf32>,
    return
  }
  func.func @transform_0(%arg0: i32) -> (i32, i32) {
    %c0_i32 = arith.constant 0 : i32
    %c0_i32_0 = arith.constant 0 : i32
    return %c0_i32, %arg0 : i32, i32
  }
  func.func @transform_1(%arg0: i32) -> (i32, i32) {
    %c0_i32 = arith.constant 0 : i32
    %c0_i32_0 = arith.constant 0 : i32
    %c0_i32_1 = arith.constant 0 : i32
    return %c0_i32, %c0_i32_0 : i32, i32
  }
  func.func @transform_2(%arg0: i32) -> (i32, i32) {
    %c0_i32 = arith.constant 0 : i32
    %c0_i32_0 = arith.constant 0 : i32
    return %c0_i32, %arg0 : i32, i32
  }
  func.func @transform_3(%arg0: i32) -> (i32, i32) {
    %c0_i32 = arith.constant 0 : i32
    %c0_i32_0 = arith.constant 0 : i32
    return %c0_i32, %arg0 : i32, i32
  }
  func.func @transform_4(%arg0: i32) -> (i32, i32) {
    %c0_i32 = arith.constant 0 : i32
    %c0_i32_0 = arith.constant 0 : i32
    return %arg0, %c0_i32 : i32, i32
  }
}

</mosaic_0001>

<bundles_post_ra>
// kernel: tpu_custom_call.1
= control target key start
LH: loop header
LB: loop body
LE: loop exit
PB: predicated region body
PF: predicated region fallthrough
CT: control target
= control target key end

     0   :  { %10 = vsyncpa [#allocation3], 0  ;;  %s475_s0 = inlined_call_operand.hbm [shape: bf16[27,128], index: 0, kind: input, shape index: {}]   ;;  %s476_s1 = inlined_call_operand.hbm [shape: bf16[13,27], index: 1, kind: input, shape index: {}]   ;;  %s477_s2 = inlined_call_operand.hbm [shape: f32[16,128], index: 2, kind: input, shape index: {}]   ;;  %s478_s3 = inlined_call_operand.hbm [shape: f32[16,128], index: 3, kind: output, shape index: {0}]   ;;  %s479_s4 = inlined_call_operand.vmem [shape: f32[32,8], index: 4, kind: output, shape index: {1}]  }
   0x1   :  { %11 = vsyncpa [#allocation6], 0 }
   0x2   :  { %12 = vsyncpa [#allocation4], 0  ;;  %s30_s17 = sshll.u32 %s476_s1, 4  ;;  %s398_s18 = smov [#allocation5]   ;;  %s31_s17 = int_to_ptr.hbm [resolvable:$true] %s30_s17 }
   0x3   :  { %s32_s19 = sshll.u32 %s398_s18, 4  ;;  %s17_s22 = sshll.u32 %s475_s0, 4  ;;  %s33_s19 = int_to_ptr.vmem [resolvable:$true] %s32_s19  ;;  %s18_s22 = int_to_ptr.hbm [resolvable:$true] %s17_s22 }
   0x4   :  { %s399_s23 = smov 64   ;;  %s400_s24 = smov 4  }
   0x5   :  { %38 = dma.hbm_to_vmem [thread:$0]  %s31_s17, 128, %s33_s19, [#allocation6], %s399_s23, %s399_s23, %s400_s24  }
   0x6   :  { %s401_s25 = smov [#allocation2]   ;;  %s43_s29 = sshll.u32 %s477_s2, 4  ;;  %s44_s29 = int_to_ptr.hbm [resolvable:$true] %s43_s29 }
   0x7   :  { %s19_s26 = sshll.u32 %s401_s25, 4  ;;  %s402_s1 = smov [#allocation7]   ;;  %s20_s26 = int_to_ptr.vmem [resolvable:$true] %s19_s26 }
   0x8   :  { %25 = dma.hbm_to_vmem [thread:$0]  %s18_s22, 256, %s20_s26, [#allocation3], %s399_s23, %s399_s23, %s400_s24  }
   0x9   :  { %s45_s30 = sshll.u32 %s402_s1, 4  ;;  %s403_s5 = smov 128   ;;  %s46_s30 = int_to_ptr.vmem [resolvable:$true] %s45_s30 }
   0xa   :  { %s404_s6 = smov 8  }
   0xb   :  { %51 = dma.hbm_to_vmem [thread:$0]  %s44_s29, 256, %s46_s30, [#allocation6], %s403_s5, %s403_s5, %s404_s6  }
   0xc   :  { %392 = dma.done.wait [#allocation3], 256  }
   0xd   :  { %393 = vsyncadd [#allocation3], 4294967040 }
   0xe   :  { %394 = dma.done.wait [#allocation6], 384  }
   0xf   :  { %395 = vsyncadd [#allocation6], 4294966912  ;;  %vm91_vm0 = vcmask 1044480   ;;  %vm92_vm1 = vcmask 1045504   ;;  %v405_v0 = vmov 65535   ;;  %v67_v6 = vld [vmem:[#allocation2] sm:$0xff]  }
  0x10   :  { %v93_v1 = vsel %vm91_vm0, 4294967295, %v405_v0  ;;  %v281_v2 = vld [vmem:[#allocation2 + $0x8] sm:$0xf]  ;;  %v286_v3 = vld [vmem:[#allocation2 + $0x8] sm:$0x30]  ;;  %v112_v7 = vunpack.c.l.bf16 %v67_v6  ;;  %v113_v8 = vunpack.c.h.bf16 %v67_v6  ;;  %v116_v9 = vld [vmem:[#allocation7] sm:$0xff] }
  0x11   :  { %v94_v4 = vsel %vm92_vm1, %v93_v1, 0  ;;  %v282_v5 = vor.u32 %v286_v3, %v281_v2  ;;  %v69_v11 = vld [vmem:[#allocation2 + $0x8] sm:$0xf]  ;;  %v144_v12 = vrot.slane %v116_v9, 7  ;;  %v285_v14 = vld [vmem:[#allocation2] sm:$0xff]  ;;  %v176_v21 = vrot.slane %v116_v9, 6 }
  0x12   :  { %v118_v13 = vadd.f32 %v116_v9, %v112_v7  ;;  %v273_v15 = vld [vmem:[#allocation5] sm:$0xf]  ;;  %v284_v16 = vld [vmem:[#allocation5] sm:$0x70]  ;;  %v114_v18 = vunpack.c.l.bf16 %v69_v11  ;;  %v70_v24 = vld [vmem:[#allocation2 + $0xc] sm:$0x3] }
  0x13   :  { %v96_v10 = vand.u32 %v282_v5, %v94_v4  ;;  %v146_v17 = vadd.f32 %v144_v12, %v113_v8  ;;  %v274_v23 = vor.u32 %v284_v16, %v273_v15  ;;  %vm87_vm2 = vcmask 220160   ;;  %v117_v36 = vld [vmem:[#allocation7 + $0x8] sm:$0xff]  ;;  %s406_s0 = smov [#allocation8]   ;;  %s253_s9 = sshll.u32 %s478_s3, 4  ;;  %s254_s9 = int_to_ptr.hbm [resolvable:$true] %s253_s9 }
  0x14   :  { %v120_v19 = vrot.slane %v118_v13, 1  ;;  %v123_v20 = vrot.slane %v118_v13, 2  ;;  %v126_v26 = vrot.slane %v118_v13, 3  ;;  %v129_v31 = vrot.slane %v118_v13, 4  ;;  %s251_s2 = sshll.u32 %s406_s0, 4  ;;  %s252_s2 = int_to_ptr.vmem [resolvable:$true] %s251_s2 }
  0x15   :  { %104 = vmatpush.bf16.msra.mxu0 %v96_v10  ;;  %v148_v22 = vrot.slane %v146_v17, 1  ;;  %v151_v27 = vrot.slane %v146_v17, 2  ;;  %v154_v29 = vrot.slane %v146_v17, 3  ;;  %v178_v32 = vadd.f32 %v176_v21, %v114_v18 }
  0x16   :  { %v122_v25 = vmax.f32 %v118_v13, %v120_v19  ;;  %v115_v33 = vunpack.c.l.bf16 %v70_v24  ;;  %v157_v35 = vrot.slane %v146_v17, 4  ;;  %v132_v38 = vrot.slane %v118_v13, 5 }
  0x17   :  { %v150_v28 = vmax.f32 %v146_v17, %v148_v22  ;;  %v180_v39 = vrot.slane %v178_v32, 1  ;;  %v183_v40 = vrot.slane %v178_v32, 2  ;;  %v160_v42 = vrot.slane %v146_v17, 5 }
  0x18   :  { %v125_v30 = vmax.f32 %v122_v25, %v123_v20  ;;  %v166_v43 = vadd.f32 %v144_v12, %v114_v18  ;;  %v135_v45 = vrot.slane %v118_v13, 6  ;;  %v186_v47 = vrot.slane %v178_v32, 3 }
  0x19   :  { %105 = vmatpush.bf16.msra.mxu0 %v285_v14  ;;  %v153_v34 = vmax.f32 %v150_v28, %v151_v27  ;;  %v182_v46 = vmax.f32 %v178_v32, %v180_v39  ;;  %v138_v48 = vrot.slane %v118_v13, 7  ;;  %v163_v50 = vrot.slane %v146_v17, 6 }
  0x1a   :  { %v128_v37 = vmax.f32 %v125_v30, %v126_v26  ;;  %v172_v51 = vrot.slane %v117_v36, 7  ;;  %v189_v54 = vrot.slane %v178_v32, 4  ;;  %v195_v55 = vadd.f32 %v176_v21, %v115_v33 }
  0x1b   :  { %v156_v41 = vmax.f32 %v153_v34, %v154_v29  ;;  %v185_v53 = vmax.f32 %v182_v46, %v183_v40  ;;  %v168_v57 = vrot.slane %v166_v43, 7  ;;  %v192_v60 = vrot.slane %v178_v32, 5 }
  0x1c   :  { %283 = vmatmul.msk.bf16.vlgmr.msra.gmra.mxu0 %vm87_vm2, %v274_v23  ;;  %v131_v44 = vmax.f32 %v128_v37, %v129_v31  ;;  %v141_v61 = vadd.f32 %v117_v36, %v113_v8  ;;  %v174_v63 = vadd.f32 %v172_v51, %v114_v18  ;;  %v197_v2 = vrot.slane %v195_v55, 6 }
  0x1d   :  { %v159_v49 = vmax.f32 %v156_v41, %v157_v35  ;;  %v188_v59 = vmax.f32 %v185_v53, %v186_v47  ;;  %v203_v3 = vrot.slane %v117_v36, 6  ;;  %v200_v6 = vrot.slane %v195_v55, 7 }
  0x1e   :  { %v134_v52 = vmax.f32 %v131_v44, %v132_v38  ;;  %vm207_vm3 = vcmask 1040384   ;;  %vm209_vm4 = vcmask 1041408   ;;  %v214_v14 = vperm.slane %v117_v36, 1 }
  0x1f   :  { %v162_v56 = vmax.f32 %v159_v49, %v160_v42  ;;  %v191_v1 = vmax.f32 %v188_v59, %v189_v54  ;;  %v205_v11 = vadd.f32 %v203_v3, %v115_v33  ;;  %vm227_vm5 = vcmask 1042432  }
  0x20   :  { %v137_v58 = vmax.f32 %v134_v52, %v135_v45  ;;  %vm231_vm6 = vcmask 59392   ;;  %vm223_vm7 = vcmask 64512   ;;  %vm225_vm8 = vcmask 61440  }
  0x21   :  { %v165_v62 = vmax.f32 %v162_v56, %v163_v50  ;;  %v194_v5 = vmax.f32 %v191_v1, %v192_v60 }
  0x22   :  { %v140_v0 = vmax.f32 %v137_v58, %v138_v48 }
  0x23   :  { %v170_v4 = vmax.f32 %v165_v62, %v168_v57  ;;  %v199_v10 = vmax.f32 %v194_v5, %v197_v2 }
  0x24   :  { %v142_v7 = vmax.f32 %v140_v0, %v141_v61 }
  0x25   :  { %v175_v9 = vmax.f32 %v170_v4, %v174_v63  ;;  %v202_v12 = vmax.f32 %v199_v10, %v200_v6 }
  0x27   :  { %v208_v13 = vsel %vm207_vm3, %v142_v7, %v175_v9  ;;  %v206_v15 = vmax.f32 %v202_v12, %v205_v11 }
  0x29   :  { %v210_v8 = vsel %vm209_vm4, %v208_v13, %v206_v15 }
  0x2a   :  { %v217_v16 = vmul.f32 %v214_v14, %v210_v8  ;;  %213 = vst [vmem:[#allocation8 + $0xd] sm:$0x7] %v210_v8 }
  0x2c   :  { %v228_v17 = vsel %vm227_vm5, %v217_v16, 0.0  ;;  %v242_v27 = vmul.f32 %v217_v16, %v210_v8 }
  0x2d   :  { %229 = vadd.xlane.f32.xlu1 %v228_v17 }
  0x2e   :  { %v243_v28 = vsel %vm227_vm5, %v242_v27, 0.0 }
  0x99   :  { %v107_v18 = vpop.f32.mrf.mxu0 }
  0x9a   :  { %211 = vst [vmem:[#allocation8] sm:$0xff] %v107_v18  ;;  %v215_v19 = vmul.f32 %v214_v14, %v107_v18 }
  0x9c   :  { %218 = vadd.xlane.f32.xlu0 %v215_v19  ;;  %v233_v20 = vmul.f32 %v215_v19, %v107_v18 }
  0x9e   :  { %235 = vadd.xlane.f32.xlu1 %v233_v20 }
  0xa0   :  { %v230_v25 = vpop.xlane.xlu1 %229 }
  0xa1   :  { %v109_v21 = vpop.f32.mrf.mxu0  ;;  %232 = vst.msk [vmem:[%s479_s4 + $0xd] sm:$0x7] %vm231_vm6, %v230_v25 }
  0xa2   :  { %212 = vst [vmem:[#allocation8 + $0x8] sm:$0x1f] %v109_v21  ;;  %v216_v22 = vmul.f32 %v214_v14, %v109_v21 }
  0xa3   :  { %259 = dma.vmem_to_hbm [thread:$0]  %s252_s2, 256, %s254_s9, [#allocation4], %s403_s5, %s403_s5, %s404_s6  }
  0xa4   :  { %v220_v23 = vsel %vm91_vm0, %v216_v22, 0.0  ;;  %v234_v24 = vmul.f32 %v216_v22, %v109_v21 }
  0xa5   :  { %221 = vadd.xlane.f32.xlu0 %v220_v23 }
  0xa6   :  { %v237_v26 = vsel %vm91_vm0, %v234_v24, 0.0 }
  0xa7   :  { %238 = vadd.xlane.f32.xlu2 %v237_v26 }
  0xaf   :  { %244 = vadd.xlane.f32.xlu2 %v243_v28 }
 0x10f   :  { %v219_v29 = vpop.xlane.xlu0 %218 }
 0x110   :  { %224 = vst.msk [vmem:[%s479_s4] sm:$0xff] %vm223_vm7, %v219_v29 }
 0x111   :  { %v236_v30 = vpop.xlane.xlu1 %235 }
 0x112   :  { %240 = vst.msk [vmem:[%s479_s4 + $0x10] sm:$0xff] %vm223_vm7, %v236_v30 }
 0x118   :  { %v222_v31 = vpop.xlane.xlu0 %221 }
 0x119   :  { %226 = vst.msk [vmem:[%s479_s4 + $0x8] sm:$0x1f] %vm225_vm8, %v222_v31 }
 0x11a   :  { %v239_v32 = vpop.xlane.xlu2 %238 }
 0x11b   :  { %241 = vst.msk [vmem:[%s479_s4 + $0x18] sm:$0x1f] %vm225_vm8, %v239_v32 }
 0x122   :  { %v245_v33 = vpop.xlane.xlu2 %244 }
 0x123   :  { %246 = vst.msk [vmem:[%s479_s4 + $0x1d] sm:$0x7] %vm231_vm6, %v245_v33 }
 0x124   :  { %396 = dma.done.wait [#allocation4], 256  }
 0x125   :  { %397 = vsyncadd [#allocation4], 4294967040 }
 0x126   :  { %268 = vsyncpa [#allocation3], 1 }
 0x127   :  { %269 = vsyncpa [#allocation6], 1 }
 0x128   :  { %270 = vsyncpa [#allocation4], 1 }

</bundles_post_ra>
